<compile_context>
chip_gen: v7x
topology: tpu7x:2x2x1
jax: 0.10.0
libtpu: 0.0.40
codegen_flags: <defaults>
</compile_context>

<pallas_src>
import jax
import jax.numpy as jnp
from jax import lax
from jax.experimental import pallas as pl
from jax.experimental.pallas import tpu as pltpu


def _round_up(a, b):
    return ((a + b - 1) // b) * b


def _make_gram_kernel(*, k_axis, nk, k_rem, num_prefetch):
    """Build one (.., k) grid-step kernel for X.T @ Y.

    x_ref : VMEM (tk, tm) tile of X (contraction dim leading -> transposed LHS)
    y_ref : VMEM (tk, tn) tile of Y
    o_ref : VMEM (tm, tn) output tile, written once on the last k step
    acc   : VMEM (tm, tn) f32 accumulator, resident across the (innermost) k axis

    `nk` / `k_rem` are static: if K is not a multiple of tk, the garbage tail rows of
    the last k block are masked to zero before the MXU dot.
    """

    def _dot(x, y):
        # Contraction on dim 0 of both operands: (tk,tm)^T @ (tk,tn) fused on the MXU.
        return lax.dot_general(
            x, y,
            dimension_numbers=(((0,), (0,)), ((), ())),
            preferred_element_type=jnp.float32,
        )

    def kernel(*refs):
        x_ref, y_ref, o_ref, acc_ref = refs[num_prefetch:]
        k = pl.program_id(k_axis)

        @pl.when(k == 0)
        def _():
            acc_ref[...] = jnp.zeros_like(acc_ref)

        x = x_ref[...]
        y = y_ref[...]

        if k_rem:  # K % tk != 0 -> mask the out-of-range tail rows on the last step only
            @pl.when(k == nk - 1)
            def _():
                rx = lax.broadcasted_iota(jnp.int32, x.shape, 0)
                ry = lax.broadcasted_iota(jnp.int32, y.shape, 0)
                xm = jnp.where(rx < k_rem, x, jnp.zeros_like(x))
                ym = jnp.where(ry < k_rem, y, jnp.zeros_like(y))
                acc_ref[...] += _dot(xm, ym)

            @pl.when(k < nk - 1)
            def _():
                acc_ref[...] += _dot(x, y)
        else:
            acc_ref[...] += _dot(x, y)

        @pl.when(k == nk - 1)
        def _():
            o_ref[...] = acc_ref[...].astype(o_ref.dtype)

    return kernel


def linear_kernel_forward(X, Y=None, *, tm=1024, tn=1024, tk=512):
    """Pallas equivalent of LinearKernel.forward: X.T @ Y (Y defaults to X).

    X: (K, M), Y: (K, N). Returns (M, N) in the promoted input dtype
    (f32 accumulation on the MXU either way).
    """
    symmetric = Y is None
    X = jnp.asarray(X)
    Y = X if symmetric else jnp.asarray(Y)

    # Keep float operands in their native width (bf16 stays bf16: native MXU rate,
    # half the HBM bytes). Non-float inputs fall back to f32.
    dtype = jnp.result_type(X.dtype, Y.dtype)
    if not jnp.issubdtype(dtype, jnp.floating):
        dtype = jnp.float32
    X = X.astype(dtype)
    Y = X if symmetric else Y.astype(dtype)
    out_dtype = dtype

    K, M = X.shape
    K2, N = Y.shape
    assert K == K2, "contraction dims must match"

    # Clamp tiles for small inputs; keep tile dims multiples of 128 so the (8,128)
    # layout constraint always holds (partial edge blocks are masked by Pallas).
    tm = min(tm, _round_up(M, 128))
    tn = min(tn, _round_up(N, 128))
    tk = min(tk, _round_up(K, 128))
    if symmetric:
        tm = tn = min(tm, tn)  # square output blocks so mirrored blocks line up

    nbm, nbn, nk = pl.cdiv(M, tm), pl.cdiv(N, tn), pl.cdiv(K, tk)
    k_rem = K - (nk - 1) * tk
    if k_rem == tk:
        k_rem = 0  # K divides evenly -> no masking branch compiled in

    # Double-buffered inputs + double-buffered output block + f32 accumulator,
    # capped below the physical VMEM of the device (v7x has only 64 MiB / TC).
    in_b = jnp.dtype(dtype).itemsize
    out_b = jnp.dtype(out_dtype).itemsize
    need = 2 * (tk * tm + tk * tn) * in_b + tm * tn * 4 + 2 * tm * tn * out_b
    try:
        vmem_cap = int(pltpu.get_tpu_info().vmem_capacity_bytes)
    except Exception:
        vmem_cap = 64 << 20
    vmem_limit = int(min(need + (16 << 20), vmem_cap - (8 << 20)))
    vmem_limit = max(vmem_limit, 32 << 20)

    compiler_params_2d = pltpu.CompilerParams(
        dimension_semantics=("parallel", "arbitrary"),
        vmem_limit_bytes=vmem_limit,
    )
    compiler_params_3d = pltpu.CompilerParams(
        dimension_semantics=("parallel", "parallel", "arbitrary"),
        vmem_limit_bytes=vmem_limit,
    )

    if symmetric:
        # Triangular schedule: linear grid index t -> (i_tab[t], j_tab[t]) with j >= i.
        nb = nbm
        pairs = [(i, j) for i in range(nb) for j in range(i, nb)]
        i_tab = jnp.asarray([p[0] for p in pairs], dtype=jnp.int32)
        j_tab = jnp.asarray([p[1] for p in pairs], dtype=jnp.int32)
        t_blocks = len(pairs)

        kernel = _make_gram_kernel(k_axis=1, nk=nk, k_rem=k_rem, num_prefetch=2)

        out = pl.pallas_call(
            kernel,
            out_shape=jax.ShapeDtypeStruct((M, M), out_dtype),
            grid_spec=pltpu.PrefetchScalarGridSpec(
                num_scalar_prefetch=2,
                grid=(t_blocks, nk),
                in_specs=[
                    pl.BlockSpec((tk, tm), lambda t, k, it, jt: (k, it[t])),
                    pl.BlockSpec((tk, tm), lambda t, k, it, jt: (k, jt[t])),
                ],
                out_specs=pl.BlockSpec((tm, tm), lambda t, k, it, jt: (it[t], jt[t])),
                scratch_shapes=[pltpu.VMEM((tm, tm), jnp.float32)],
            ),
            compiler_params=compiler_params_2d,
        )(i_tab, j_tab, X, X)

        # Mirror: every never-computed (strictly block-lower) element has row > col,
        # and its transpose partner lies in a computed block -> element-wise select.
        r = jnp.arange(M, dtype=jnp.int32)[:, None]
        c = jnp.arange(M, dtype=jnp.int32)[None, :]
        return jnp.where(r <= c, out, out.T)

    kernel = _make_gram_kernel(k_axis=2, nk=nk, k_rem=k_rem, num_prefetch=0)

    return pl.pallas_call(
        kernel,
        out_shape=jax.ShapeDtypeStruct((M, N), out_dtype),
        grid_spec=pltpu.PrefetchScalarGridSpec(
            num_scalar_prefetch=0,
            grid=(nbm, nbn, nk),
            in_specs=[
                pl.BlockSpec((tk, tm), lambda i, j, k: (k, i)),  # X tile (contraction leading)
                pl.BlockSpec((tk, tn), lambda i, j, k: (k, j)),  # Y tile
            ],
            out_specs=pl.BlockSpec((tm, tn), lambda i, j, k: (i, j)),
            scratch_shapes=[pltpu.VMEM((tm, tn), jnp.float32)],
        ),
        compiler_params=compiler_params_3d,
    )(X, Y)


if __name__ == "__main__":
    # TODO(synk): the base-class `pairwise_dist` (scipy pdist/cdist) and the unused
    # grad/numpy flags are outside the LinearKernel forward path and are not ported.
    key = jax.random.PRNGKey(0)
    kx, ky, ka, kb, kc = jax.random.split(key, 5)

    # Tile-aligned case: X is (m, m) as in the reference module.
    m = 128
    X = jax.random.normal(kx, (m, m), dtype=jnp.float32)
    Y = jax.random.normal(ky, (m, m), dtype=jnp.float32)

    out_xx = linear_kernel_forward(X)        # symmetric (Y=None) path
    out_xy = linear_kernel_forward(X, Y)     # general path

    # bf16 operands stay bf16 (native MXU rate, f32 accumulation, bf16 output).
    Xb = jax.random.normal(kc, (m, m), dtype=jnp.bfloat16)
    out_bb = linear_kernel_forward(Xb)

    # Ragged K/M/N: K tail masked in-kernel, M/N edge blocks handled by Pallas masking.
    Xr = jax.random.normal(ka, (100, 120), dtype=jnp.float32)
    Yr = jax.random.normal(kb, (100, 72), dtype=jnp.float32)
    out_rag = linear_kernel_forward(Xr, Yr)

    # Multi-block symmetric case (forces the triangular grid + mirror post-pass).
    Xs = jax.random.normal(ky, (64, 300), dtype=jnp.float32)
    out_sym = linear_kernel_forward(Xs, tm=128, tn=128, tk=128)

    jax.block_until_ready((out_xx, out_xy, out_bb, out_rag, out_sym))

    assert jnp.allclose(out_xx, X.T @ X, atol=1e-4, rtol=1e-4)
    assert jnp.allclose(out_xy, X.T @ Y, atol=1e-4, rtol=1e-4)
    assert jnp.allclose(out_rag, Xr.T @ Yr, atol=1e-4, rtol=1e-4)
    assert jnp.allclose(out_sym, Xs.T @ Xs, atol=1e-4, rtol=1e-4)

    Xb32 = Xb.astype(jnp.float32)
    assert out_bb.dtype == jnp.bfloat16
    assert jnp.allclose(out_bb.astype(jnp.float32), Xb32.T @ Xb32, atol=1e-1, rtol=2e-2)

    print("KERNEL_OK")
</pallas_src>

<mosaic_0001>
module attributes {stable_mosaic.version = 11 : i64} {
  func.func @kernel(%arg0: i32, %arg1: i32, %arg2: memref<1xi32, #tpu.memory_space<smem>>, %arg3: memref<1xi32, #tpu.memory_space<smem>>, %arg4: memref<128x128xf32, #tpu.memory_space<vmem>>, %arg5: memref<128x128xf32, #tpu.memory_space<vmem>>, %arg6: memref<128x128xf32, #tpu.memory_space<vmem>>, %arg7: memref<128x128xf32, #tpu.memory_space<vmem>>) attributes {dimension_semantics = [#tpu.dimension_semantics<parallel>, #tpu.dimension_semantics<arbitrary>], iteration_bounds = array<i64: 1, 1>, scalar_prefetch = 2 : i64, scratch_operands = 1 : i64, tpu.core_type = #tpu.core_type<tc>, window_params = [{transform_indices = @transform_0, window_bounds = array<i64: 128, 128>}, {transform_indices = @transform_1, window_bounds = array<i64: 128, 128>}, {transform_indices = @transform_2, window_bounds = array<i64: 128, 128>}]} {
    %c0_i32 = arith.constant 0 : i32
    %0 = arith.cmpi eq, %arg1, %c0_i32 : i32
    %1 = arith.extui %0 : i1 to i32
    %c0_i32_0 = arith.constant 0 : i32
    %2 = arith.cmpi ne, %1, %c0_i32_0 : i32
    scf.if %2 {
      %cst_10 = arith.constant 0.000000e+00 : f32
      %12 = vector.broadcast %cst_10 : f32 to vector<128x128xf32>
      %c0_11 = arith.constant 0 : index
      %c0_12 = arith.constant 0 : index
      %13 = vector.load %arg7[%c0_11, %c0_12] : memref<128x128xf32, #tpu.memory_space<vmem>>, vector<128x128xf32>
      tpu.vector_store %arg7[%c0_11, %c0_12], %12 {strides = array<i32>} : memref<128x128xf32, #tpu.memory_space<vmem>>, vector<128x128xf32>,
    } else {
    }
    %c0 = arith.constant 0 : index
    %c0_1 = arith.constant 0 : index
    %3 = vector.load %arg4[%c0, %c0_1] : memref<128x128xf32, #tpu.memory_space<vmem>>, vector<128x128xf32>
    %c0_2 = arith.constant 0 : index
    %c0_3 = arith.constant 0 : index
    %4 = vector.load %arg5[%c0_2, %c0_3] : memref<128x128xf32, #tpu.memory_space<vmem>>, vector<128x128xf32>
    %c0_4 = arith.constant 0 : index
    %c0_5 = arith.constant 0 : index
    %5 = vector.load %arg7[%c0_4, %c0_5] : memref<128x128xf32, #tpu.memory_space<vmem>>, vector<128x128xf32>
    %cst = arith.constant dense<0.000000e+00> : vector<128x128xf32>
    %6 = tpu.matmul %3, %4, %cst {dimension_numbers = #tpu.dot_dimension_numbers<[0], [0], [1], [1], [0, 1, 1, 1], [], []>} : vector<128x128xf32>, vector<128x128xf32>, vector<128x128xf32> -> vector<128x128xf32>
    %7 = arith.addf %5, %6 : vector<128x128xf32>
    %c0_6 = arith.constant 0 : index
    %c0_7 = arith.constant 0 : index
    %8 = vector.load %arg7[%c0_6, %c0_7] : memref<128x128xf32, #tpu.memory_space<vmem>>, vector<128x128xf32>
    tpu.vector_store %arg7[%c0_6, %c0_7], %7 {strides = array<i32>} : memref<128x128xf32, #tpu.memory_space<vmem>>, vector<128x128xf32>,
    %c0_i32_8 = arith.constant 0 : i32
    %9 = arith.cmpi eq, %arg1, %c0_i32_8 : i32
    %10 = arith.extui %9 : i1 to i32
    %c0_i32_9 = arith.constant 0 : i32
    %11 = arith.cmpi ne, %10, %c0_i32_9 : i32
    scf.if %11 {
      %c0_10 = arith.constant 0 : index
      %c0_11 = arith.constant 0 : index
      %12 = vector.load %arg7[%c0_10, %c0_11] : memref<128x128xf32, #tpu.memory_space<vmem>>, vector<128x128xf32>
      %c0_12 = arith.constant 0 : index
      %c0_13 = arith.constant 0 : index
      %13 = vector.load %arg6[%c0_12, %c0_13] : memref<128x128xf32, #tpu.memory_space<vmem>>, vector<128x128xf32>
      tpu.vector_store %arg6[%c0_12, %c0_13], %12 {strides = array<i32>} : memref<128x128xf32, #tpu.memory_space<vmem>>, vector<128x128xf32>,
    } else {
    }
    return
  }
  func.func @transform_0(%arg0: i32, %arg1: i32, %arg2: memref<1xi32, #tpu.memory_space<smem>>, %arg3: memref<1xi32, #tpu.memory_space<smem>>) -> (i32, i32) {
    %0 = arith.index_cast %arg0 : i32 to index
    %1 = memref.load %arg2[%0] : memref<1xi32, #tpu.memory_space<smem>>
    %c0_i32 = arith.constant 0 : i32
    return %arg1, %1 : i32, i32
  }
  func.func @transform_1(%arg0: i32, %arg1: i32, %arg2: memref<1xi32, #tpu.memory_space<smem>>, %arg3: memref<1xi32, #tpu.memory_space<smem>>) -> (i32, i32) {
    %0 = arith.index_cast %arg0 : i32 to index
    %1 = memref.load %arg3[%0] : memref<1xi32, #tpu.memory_space<smem>>
    %c0_i32 = arith.constant 0 : i32
    return %arg1, %1 : i32, i32
  }
  func.func @transform_2(%arg0: i32, %arg1: i32, %arg2: memref<1xi32, #tpu.memory_space<smem>>, %arg3: memref<1xi32, #tpu.memory_space<smem>>) -> (i32, i32) {
    %0 = arith.index_cast %arg0 : i32 to index
    %1 = memref.load %arg2[%0] : memref<1xi32, #tpu.memory_space<smem>>
    %2 = arith.index_cast %arg0 : i32 to index
    %3 = memref.load %arg3[%2] : memref<1xi32, #tpu.memory_space<smem>>
    %c0_i32 = arith.constant 0 : i32
    return %1, %3 : i32, i32
  }
}

</mosaic_0001>

<bundles_post_ra>
// kernel: tpu_custom_call.1
= control target key start
LH: loop header
LB: loop body
LE: loop exit
PB: predicated region body
PF: predicated region fallthrough
CT: control target
= control target key end

     0   :  { %11 = vsyncpa [#allocation7], 0  ;;  %s700_s0 = inlined_call_operand.<no memory space> [shape: s32[1], index: 0, kind: input, shape index: {}]   ;;  %s701_s1 = inlined_call_operand.<no memory space> [shape: s32[1], index: 1, kind: input, shape index: {}]   ;;  %s702_s2 = inlined_call_operand.hbm [shape: f32[128,128], index: 2, kind: input, shape index: {}]   ;;  %s703_s3 = inlined_call_operand.hbm [shape: f32[128,128], index: 3, kind: input, shape index: {}]   ;;  %s704_s4 = inlined_call_operand.hbm [shape: f32[128,128], index: 4, kind: output, shape index: {}]  }
   0x1   :  { %12 = vsyncpa [#allocation10], 0 }
   0x2   :  { %13 = vsyncpa [#allocation8], 0  ;;  %s399_s17 = sshll.u32 %s700_s0, 7  ;;  %s622_s21 = smov [#allocation6]  }
   0x3   :  { %s21_s20 = scalar_lea.hbm %s702_s2, %s399_s17  ;;  %s22_s22 = sshll.u32 %s622_s21, 4  ;;  %s23_s22 = int_to_ptr.vmem [resolvable:$true] %s22_s22 }
   0x4   :  { %s400_s25 = sshll.u32 %s701_s1, 7  ;;  %s544_s26 = scalar_lea.hbm %s21_s20, 2048 }
   0x5   :  { %p545_p0 = scmp.ne.s32.totalorder %s21_s20, %s544_s26  ;;  %s546_s29 = scalar_lea.hbm %s702_s2, 2048 }
   0x6   :  { %p547_p1 = scmp.lt.u32.totalorder %s21_s20, %s702_s2  ;;  %p548_p2 = scmp.lt.u32.totalorder %s546_s29, %s544_s26 }
   0x7   :  { %p550_p4 = scmp.lt.u32.totalorder %s544_s26, %s21_s20 }
   0x8   :  { %p549_p3 = por %p548_p2, %p547_p1 }
   0xa   :  { %p551_p5 = por %p550_p4, %p549_p3 }
   0xc   :  { %p552_p6 = pnand %p551_p5, %p545_p0 }
   0xe   :  { %555 = shalt.err (!%p552_p6)
}
   0xf   :  { %s556_s6 = scalar_lea.vmem %s23_s22, 2048  ;;  %p561_p8 = scmp.lt.s32.totalorder %s23_s22, %s23_s22 }
  0x10   :  { %p557_p7 = scmp.ne.s32.totalorder %s23_s22, %s556_s6  ;;  %p562_p9 = scmp.lt.s32.totalorder %s556_s6, %s556_s6 }
  0x12   :  { %p563_p10 = por %p562_p9, %p561_p8 }
  0x14   :  { %p564_p11 = pnand %p563_p10, %p557_p7 }
  0x16   :  { %567 = shalt.err (!%p564_p11)
}
  0x17   :  { %s623_s7 = smov 128   ;;  %s624_s8 = smov 8  }
  0x18   :  { %28 = dma.hbm_to_vmem [thread:$0]  %s21_s20, 2048, %s23_s22, [#allocation7], %s623_s7, %s623_s7, %s624_s8  }
  0x19   :  { %s36_s10 = scalar_lea.hbm %s703_s3, %s400_s25  ;;  %s625_s11 = smov [#allocation9]  }
  0x1a   :  { %s37_s12 = sshll.u32 %s625_s11, 4  ;;  %s568_s13 = scalar_lea.hbm %s36_s10, 2048  ;;  %s38_s12 = int_to_ptr.vmem [resolvable:$true] %s37_s12 }
  0x1b   :  { %p569_p12 = scmp.ne.s32.totalorder %s36_s10, %s568_s13  ;;  %s570_s16 = scalar_lea.hbm %s703_s3, 2048 }
  0x1c   :  { %p571_p13 = scmp.lt.u32.totalorder %s36_s10, %s703_s3  ;;  %p572_p0 = scmp.lt.u32.totalorder %s570_s16, %s568_s13 }
  0x1d   :  { %p574_p2 = scmp.lt.u32.totalorder %s568_s13, %s36_s10 }
  0x1e   :  { %p573_p1 = por %p572_p0, %p571_p13 }
  0x20   :  { %p575_p3 = por %p574_p2, %p573_p1 }
  0x22   :  { %p576_p4 = pnand %p575_p3, %p569_p12 }
  0x24   :  { %579 = shalt.err (!%p576_p4)
}
  0x25   :  { %s580_s19 = scalar_lea.vmem %s38_s12, 2048  ;;  %p585_p6 = scmp.lt.s32.totalorder %s38_s12, %s38_s12 }
  0x26   :  { %p581_p5 = scmp.ne.s32.totalorder %s38_s12, %s580_s19  ;;  %p586_p7 = scmp.lt.s32.totalorder %s580_s19, %s580_s19 }
  0x28   :  { %p587_p8 = por %p586_p7, %p585_p6 }
  0x2a   :  { %p588_p9 = pnand %p587_p8, %p581_p5 }
  0x2c   :  { %591 = shalt.err (!%p588_p9)
}
  0x2d   :  { %43 = dma.hbm_to_vmem [thread:$0]  %s36_s10, 2048, %s38_s12, [#allocation10], %s623_s7, %s623_s7, %s624_s8  }
  0x2e   :  { %616 = dma.done.wait [#allocation7], 2048  }
  0x2f   :  { %617 = vsyncadd [#allocation7], 4294965248 }
  0x30   :  { %618 = dma.done.wait [#allocation10], 2048  }
  0x31   :  { %619 = vsyncadd [#allocation10], 4294965248  ;;  %v75_v0 = vld [vmem:[#allocation6] sm:$0xff]  ;;  %v76_v1 = vld [vmem:[#allocation6 + $0x8] sm:$0xff]  ;;  %s401_s21 = sshll.u32 %s700_s0, 4  ;;  %s626_s26 = smov [#allocation11]  }
  0x32   :  { %123 = vxpose.xlu0.b32.start [1/16] %v75_v0, 128  ;;  %v91_v2 = vld [vmem:[#allocation9] sm:$0xff]  ;;  %v92_v3 = vld [vmem:[#allocation9 + $0x8] sm:$0xff]  ;;  %v77_v4 = vld [vmem:[#allocation6 + $0x10] sm:$0xff]  ;;  %s375_s24 = sadd.s32 %s401_s21, %s701_s1  ;;  %s378_s27 = sshll.u32 %s626_s26, 4  ;;  %s379_s27 = int_to_ptr.vmem [resolvable:$true] %s378_s27 }
  0x33   :  { %v491_v5 = vpack.c.bf16 %v92_v3, %v91_v2  ;;  %v93_v6 = vld [vmem:[#allocation9 + $0x10] sm:$0xff]  ;;  %v94_v7 = vld [vmem:[#allocation9 + $0x18] sm:$0xff]  ;;  %v95_v9 = vld [vmem:[#allocation9 + $0x20] sm:$0xff]  ;;  %s402_s25 = sshll.u32 %s375_s24, 7  ;;  %s592_s0 = scalar_lea.vmem %s379_s27, 2048 }
  0x34   :  { %v495_v8 = vpack.c.bf16 %v94_v7, %v93_v6  ;;  %v96_v10 = vld [vmem:[#allocation9 + $0x28] sm:$0xff]  ;;  %v78_v11 = vld [vmem:[#allocation6 + $0x18] sm:$0xff]  ;;  %v97_v13 = vld [vmem:[#allocation9 + $0x30] sm:$0xff]  ;;  %s377_s30 = scalar_lea.hbm %s704_s4, %s402_s25  ;;  %p593_p10 = scmp.ne.s32.totalorder %s379_s27, %s592_s0 }
  0x35   :  { %492 = vmatprep.subr.bf16.mxu0 %v491_v5  ;;  %523 = vmatprep.subr.bf16.mxu1 %v491_v5  ;;  %v499_v12 = vpack.c.bf16 %v96_v10, %v95_v9  ;;  %v98_v14 = vld [vmem:[#allocation9 + $0x38] sm:$0xff]  ;;  %v79_v15 = vld [vmem:[#allocation6 + $0x20] sm:$0xff]  ;;  %v100_v18 = vld [vmem:[#allocation9 + $0x48] sm:$0xff]  ;;  %p597_p11 = scmp.lt.s32.totalorder %s379_s27, %s379_s27  ;;  %p598_p12 = scmp.lt.s32.totalorder %s592_s0, %s592_s0 }
  0x36   :  { %124 = vxpose.xlu0.b32.cont [2/16] %v76_v1, 128  ;;  %494 = vmatpush3.bf16.msra.mxu0 %v491_v5  ;;  %v503_v16 = vpack.c.bf16 %v98_v14, %v97_v13  ;;  %v99_v17 = vld [vmem:[#allocation9 + $0x40] sm:$0xff]  ;;  %v80_v19 = vld [vmem:[#allocation6 + $0x28] sm:$0xff]  ;;  %v101_v21 = vld [vmem:[#allocation9 + $0x50] sm:$0xff] }
  0x37   :  { %496 = vmatprep.subr.bf16.mxu0 %v495_v8  ;;  %531 = vmatpush3.bf16.msra.mxu1 %v491_v5  ;;  %v507_v20 = vpack.c.bf16 %v100_v18, %v99_v17  ;;  %v102_v22 = vld [vmem:[#allocation9 + $0x58] sm:$0xff]  ;;  %v81_v23 = vld [vmem:[#allocation6 + $0x30] sm:$0xff]  ;;  %v103_v25 = vld [vmem:[#allocation9 + $0x60] sm:$0xff]  ;;  %p599_p13 = por %p598_p12, %p597_p11 }
  0x38   :  { %524 = vmatprep.subr.bf16.mxu1 %v495_v8  ;;  %v511_v24 = vpack.c.bf16 %v102_v22, %v101_v21  ;;  %v104_v26 = vld [vmem:[#allocation9 + $0x68] sm:$0xff]  ;;  %v82_v27 = vld [vmem:[#allocation6 + $0x38] sm:$0xff]  ;;  %v105_v29 = vld [vmem:[#allocation9 + $0x70] sm:$0xff] }
  0x39   :  { %v515_v28 = vpack.c.bf16 %v104_v26, %v103_v25  ;;  %v106_v30 = vld [vmem:[#allocation9 + $0x78] sm:$0xff]  ;;  %v83_v31 = vld [vmem:[#allocation6 + $0x40] sm:$0xff]  ;;  %v84_v33 = vld [vmem:[#allocation6 + $0x48] sm:$0xff]  ;;  %p600_p0 = pnand %p599_p13, %p593_p10 }
  0x3a   :  { %125 = vxpose.xlu0.b32.cont [3/16] %v77_v4, 128  ;;  %498 = vmatpush3.bf16.msra.mxu0 %v495_v8  ;;  %v519_v32 = vpack.c.bf16 %v106_v30, %v105_v29  ;;  %v85_v34 = vld [vmem:[#allocation6 + $0x50] sm:$0xff]  ;;  %v86_v35 = vld [vmem:[#allocation6 + $0x58] sm:$0xff]  ;;  %v87_v36 = vld [vmem:[#allocation6 + $0x60] sm:$0xff] }
  0x3b   :  { %500 = vmatprep.subr.bf16.mxu0 %v499_v12  ;;  %532 = vmatpush3.bf16.msra.mxu1 %v495_v8  ;;  %v88_v37 = vld [vmem:[#allocation6 + $0x68] sm:$0xff]  ;;  %v89_v38 = vld [vmem:[#allocation6 + $0x70] sm:$0xff]  ;;  %v90_v39 = vld [vmem:[#allocation6 + $0x78] sm:$0xff] }
  0x3c   :  { %525 = vmatprep.subr.bf16.mxu1 %v499_v12 }
  0x3e   :  { %126 = vxpose.xlu0.b32.cont [4/16] %v78_v11, 128  ;;  %502 = vmatpush3.bf16.msra.mxu0 %v499_v12 }
  0x3f   :  { %504 = vmatprep.subr.bf16.mxu0 %v503_v16  ;;  %533 = vmatpush3.bf16.msra.mxu1 %v499_v12 }
  0x40   :  { %526 = vmatprep.subr.bf16.mxu1 %v503_v16 }
  0x42   :  { %127 = vxpose.xlu0.b32.cont [5/16] %v79_v15, 128  ;;  %506 = vmatpush3.bf16.msra.mxu0 %v503_v16 }
  0x43   :  { %508 = vmatprep.subr.bf16.mxu0 %v507_v20  ;;  %534 = vmatpush3.bf16.msra.mxu1 %v503_v16 }
  0x44   :  { %527 = vmatprep.subr.bf16.mxu1 %v507_v20 }
  0x46   :  { %128 = vxpose.xlu0.b32.cont [6/16] %v80_v19, 128  ;;  %510 = vmatpush3.bf16.msra.mxu0 %v507_v20 }
  0x47   :  { %512 = vmatprep.subr.bf16.mxu0 %v511_v24  ;;  %535 = vmatpush3.bf16.msra.mxu1 %v507_v20 }
  0x48   :  { %528 = vmatprep.subr.bf16.mxu1 %v511_v24 }
  0x4a   :  { %129 = vxpose.xlu0.b32.cont [7/16] %v81_v23, 128  ;;  %514 = vmatpush3.bf16.msra.mxu0 %v511_v24 }
  0x4b   :  { %516 = vmatprep.subr.bf16.mxu0 %v515_v28  ;;  %536 = vmatpush3.bf16.msra.mxu1 %v511_v24 }
  0x4c   :  { %529 = vmatprep.subr.bf16.mxu1 %v515_v28 }
  0x4e   :  { %130 = vxpose.xlu0.b32.cont [8/16] %v82_v27, 128  ;;  %518 = vmatpush3.bf16.msra.mxu0 %v515_v28 }
  0x4f   :  { %520 = vmatprep.subr.bf16.mxu0 %v519_v32  ;;  %537 = vmatpush3.bf16.msra.mxu1 %v515_v28 }
  0x50   :  { %530 = vmatprep.subr.bf16.mxu1 %v519_v32 }
  0x52   :  { %131 = vxpose.xlu0.b32.cont [9/16] %v83_v31, 128  ;;  %522 = vmatpush3.bf16.msra.mxu0 %v519_v32 }
  0x53   :  { %538 = vmatpush3.bf16.msra.mxu1 %v519_v32 }
  0x56   :  { %132 = vxpose.xlu0.b32.cont [10/16] %v84_v33, 128 }
  0x5a   :  { %133 = vxpose.xlu0.b32.cont [11/16] %v85_v34, 128 }
  0x5e   :  { %134 = vxpose.xlu0.b32.cont [12/16] %v86_v35, 128 }
  0x62   :  { %135 = vxpose.xlu0.b32.cont [13/16] %v87_v36, 128 }
  0x66   :  { %136 = vxpose.xlu0.b32.cont [14/16] %v88_v37, 128 }
  0x6a   :  { %137 = vxpose.xlu0.b32.cont [15/16] %v89_v38, 128 }
  0x6e   :  { %138 = vxpose.xlu0.b32.end [16/16] %v90_v39, 128 }
  0xb2   :  { %v139_v40 = vpop.trf.xlu0 }
  0xb3   :  { %467 = vmatprep.mubr.f32.mxu0 %v139_v40 }
  0xb6   :  { %v140_v41 = vpop.trf.xlu0 }
  0xb7   :  { %468 = vmatmul.mubr.f32.vlgmr.msra.gmra.mrb[0].mxu0 %v140_v41 }
  0xba   :  { %v141_v42 = vpop.trf.xlu0 }
  0xbb   :  { %470 = vmatprep.mubr.f32.mxu0 %v141_v42 }
  0xbe   :  { %v142_v43 = vpop.trf.xlu0 }
  0xbf   :  { %471 = vmatmul.mubr.f32.gmra.mrb[2].mxu0 %v142_v43 }
  0xc2   :  { %v143_v44 = vpop.trf.xlu0 }
  0xc3   :  { %473 = vmatprep.mubr.f32.mxu0 %v143_v44 }
  0xc6   :  { %v144_v45 = vpop.trf.xlu0 }
  0xc7   :  { %474 = vmatmul.mubr.f32.gmra.mrb[4].mxu0 %v144_v45 }
  0xca   :  { %v145_v46 = vpop.trf.xlu0 }
  0xcb   :  { %476 = vmatprep.mubr.f32.mxu0 %v145_v46 }
  0xce   :  { %v146_v47 = vpop.trf.xlu0 }
  0xcf   :  { %477 = vmatmul.mubr.f32.gmra.mrb[6].mxu0 %v146_v47 }
  0xd2   :  { %v147_v48 = vpop.trf.xlu0 }
  0xd3   :  { %479 = vmatprep.mubr.f32.mxu1 %v147_v48 }
  0xd6   :  { %v148_v49 = vpop.trf.xlu0 }
  0xd7   :  { %480 = vmatmul.mubr.f32.vlgmr.msra.gmra.mrb[0].mxu1 %v148_v49 }
  0xda   :  { %v149_v50 = vpop.trf.xlu0 }
  0xdb   :  { %482 = vmatprep.mubr.f32.mxu1 %v149_v50 }
  0xde   :  { %v150_v51 = vpop.trf.xlu0 }
  0xdf   :  { %483 = vmatmul.mubr.f32.gmra.mrb[2].mxu1 %v150_v51 }
  0xe2   :  { %v151_v52 = vpop.trf.xlu0 }
  0xe3   :  { %485 = vmatprep.mubr.f32.mxu1 %v151_v52 }
  0xe6   :  { %v152_v53 = vpop.trf.xlu0 }
  0xe7   :  { %486 = vmatmul.mubr.f32.gmra.mrb[4].mxu1 %v152_v53 }
  0xea   :  { %v153_v54 = vpop.trf.xlu0 }
  0xeb   :  { %488 = vmatprep.mubr.f32.mxu1 %v153_v54 }
  0xee   :  { %v154_v55 = vpop.trf.xlu0 }
  0xef   :  { %489 = vmatmul.mubr.f32.gmra.mrb[6].mxu1 %v154_v55 }
 0x18a   :  { %v469_v56 = vpop.f32.mrb[0].mxu0 }
 0x18b   :  { %352 = vst [vmem:[#allocation11 + $0x8] sm:$0xff] %v469_v56  ;;  %v221_v57 = vpop.f32.mrb[1].mxu0 }
 0x18c   :  { %351 = vst [vmem:[#allocation11] sm:$0xff] %v221_v57 }
 0x192   :  { %v472_v58 = vpop.f32.mrb[2].mxu0 }
 0x193   :  { %354 = vst [vmem:[#allocation11 + $0x18] sm:$0xff] %v472_v58  ;;  %v231_v59 = vpop.f32.mrb[3].mxu0 }
 0x194   :  { %353 = vst [vmem:[#allocation11 + $0x10] sm:$0xff] %v231_v59 }
 0x19a   :  { %v475_v60 = vpop.f32.mrb[4].mxu0 }
 0x19b   :  { %356 = vst [vmem:[#allocation11 + $0x28] sm:$0xff] %v475_v60  ;;  %v241_v61 = vpop.f32.mrb[5].mxu0 }
 0x19c   :  { %355 = vst [vmem:[#allocation11 + $0x20] sm:$0xff] %v241_v61 }
 0x1a2   :  { %v478_v62 = vpop.f32.mrb[6].mxu0 }
 0x1a3   :  { %358 = vst [vmem:[#allocation11 + $0x38] sm:$0xff] %v478_v62  ;;  %v251_v63 = vpop.f32.mrb[7].mxu0 }
 0x1a4   :  { %357 = vst [vmem:[#allocation11 + $0x30] sm:$0xff] %v251_v63 }
 0x1aa   :  { %v481_v0 = vpop.f32.mrb[0].mxu1 }
 0x1ab   :  { %360 = vst [vmem:[#allocation11 + $0x48] sm:$0xff] %v481_v0  ;;  %v261_v1 = vpop.f32.mrb[1].mxu1 }
 0x1ac   :  { %359 = vst [vmem:[#allocation11 + $0x40] sm:$0xff] %v261_v1 }
 0x1b2   :  { %v484_v2 = vpop.f32.mrb[2].mxu1 }
 0x1b3   :  { %362 = vst [vmem:[#allocation11 + $0x58] sm:$0xff] %v484_v2  ;;  %v271_v3 = vpop.f32.mrb[3].mxu1 }
 0x1b4   :  { %361 = vst [vmem:[#allocation11 + $0x50] sm:$0xff] %v271_v3 }
 0x1ba   :  { %v487_v4 = vpop.f32.mrb[4].mxu1 }
 0x1bb   :  { %364 = vst [vmem:[#allocation11 + $0x68] sm:$0xff] %v487_v4  ;;  %v281_v5 = vpop.f32.mrb[5].mxu1 }
 0x1bc   :  { %363 = vst [vmem:[#allocation11 + $0x60] sm:$0xff] %v281_v5 }
 0x1c2   :  { %v490_v6 = vpop.f32.mrb[6].mxu1 }
 0x1c3   :  { %366 = vst [vmem:[#allocation11 + $0x78] sm:$0xff] %v490_v6  ;;  %v291_v7 = vpop.f32.mrb[7].mxu1 }
 0x1c4   :  { %365 = vst [vmem:[#allocation11 + $0x70] sm:$0xff] %v291_v7 }
 0x1c5   :  { %603 = shalt.err (!%p600_p0)
}
 0x1c6   :  { %s604_s1 = scalar_lea.hbm %s377_s30, 2048  ;;  %s606_s2 = scalar_lea.hbm %s704_s4, 2048 }
 0x1c7   :  { %p605_p1 = scmp.ne.s32.totalorder %s377_s30, %s604_s1  ;;  %p607_p2 = scmp.lt.u32.totalorder %s377_s30, %s704_s4 }
 0x1c8   :  { %p608_p3 = scmp.lt.u32.totalorder %s606_s2, %s604_s1  ;;  %p610_p5 = scmp.lt.u32.totalorder %s604_s1, %s377_s30 }
 0x1ca   :  { %p609_p4 = por %p608_p3, %p607_p2 }
 0x1cc   :  { %p611_p6 = por %p610_p5, %p609_p4 }
 0x1ce   :  { %p612_p7 = pnand %p611_p6, %p605_p1 }
 0x1d0   :  { %615 = shalt.err (!%p612_p7)
}
 0x1d1   :  { %384 = dma.vmem_to_hbm [thread:$0]  %s379_s27, 2048, %s377_s30, [#allocation8], %s623_s7, %s623_s7, %s624_s8  }
 0x1d2   :  { %620 = dma.done.wait [#allocation8], 2048  }
 0x1d3   :  { %621 = vsyncadd [#allocation8], 4294965248 }
 0x1d4   :  { %388 = vsyncpa [#allocation7], 1 }
 0x1d5   :  { %389 = vsyncpa [#allocation10], 1 }
 0x1d6   :  { %390 = vsyncpa [#allocation8], 1 }

</bundles_post_ra>
